<compile_context>
chip_gen: v6e
topology: v6e:2x2x1
jax: 0.10.0
libtpu: 0.0.40
codegen_flags: <defaults>
</compile_context>

<pallas_src>
import functools

import jax
import jax.numpy as jnp
from jax import lax
from jax.experimental import pallas as pl
from jax.experimental.pallas import tpu as pltpu


def _icarl_kernel(x_ref, old_ref, lbl_ref, out_ref, *,
                  ignore_index, c_old, bkg, p_real, tp, needs_mask,
                  compute_dtype):
    cd = compute_dtype
    x = x_ref[0].astype(cd)        # (C, TP) logits
    old = old_ref[0].astype(cd)    # (C_old, TP) old-model outputs
    lbl = lbl_ref[0]               # (1, TP) int32 labels
    c = x.shape[0]

    # Per-pixel (1, TP) label predicate (hoisted off the (C, TP) plane):
    # a pixel keeps its one-hot target only on channels the old model does
    # not overwrite.
    valid = lbl != ignore_index
    if bkg:
        valid = valid & ((lbl == 0) | (lbl >= c_old))   # old replaces 1..c_old-1
    else:
        valid = valid & (lbl >= c_old)                  # old replaces 0..c_old-1
    lbl_eff = jnp.where(valid, lbl, -1)

    chan = lax.broadcasted_iota(jnp.int32, (c, tp), 0)
    x_t = jnp.where(chan == lbl_eff, x, 0.0)            # x * one-hot(new) target

    # BCE-with-logits: max(x,0) - x*t + log1p(exp(-|x|)).  The target enters
    # only linearly, so the old-model channels contribute a separate -x*old
    # term over the first c_old logit rows (no need to pad `old` up to C rows).
    base = jnp.maximum(x, 0.0) - x_t + jnp.log1p(jnp.exp(-jnp.abs(x)))

    x_head = x[:c_old, :]                                # offset-0 sublane prefix slice
    prod_old = x_head * old
    if bkg:
        prod_old = jnp.where(chan[:c_old, :] >= 1, prod_old, 0.0)

    # Channel reduction, accumulated in f32.
    if c >= 64 and base.dtype == jnp.bfloat16:
        # Large C, bf16 perf mode: offload the sublane reduce to the idle MXU
        # (bf16 inputs, exact f32 accumulation).
        ones_c = jnp.ones((8, c), base.dtype)
        ones_h = jnp.ones((8, c_old), prod_old.dtype)
        loss_px = (
            jnp.dot(ones_c, base, preferred_element_type=jnp.float32)[0:1, :]
            - jnp.dot(ones_h, prod_old, preferred_element_type=jnp.float32)[0:1, :])
    else:
        # Merged reduction: C rows reduced (not C + C_old).  Head is an
        # offset-0 prefix slice (cheap); the suffix slice is only the (few)
        # new-class rows.
        loss_px = jnp.sum(base[:c_old, :] - prod_old, axis=0, keepdims=True,
                          dtype=jnp.float32)
        if c > c_old:
            loss_px = loss_px + jnp.sum(base[c_old:, :], axis=0, keepdims=True,
                                        dtype=jnp.float32)

    if needs_mask:  # ragged last pixel tile (or tiny-P lane pad): zero past P
        pix = pl.program_id(1) * tp + lax.broadcasted_iota(jnp.int32, (1, tp), 1)
        loss_px = jnp.where(pix < p_real, loss_px, 0.0)

    # Fold the TP lanes into a single lane-dense (1, 128) partial sum
    # (static 128-aligned lane slices -> cheap vreg-column adds, no relayout).
    part = loss_px[:, 0:128]
    for k in range(1, tp // 128):
        part = part + loss_px[:, k * 128:(k + 1) * 128]
    out_ref[...] = part


def _vmem_budgets():
    """(vmem_limit_bytes, tile_budget_bytes) from the local chip's VMEM size."""
    try:
        cap = int(pltpu.get_tpu_info().vmem_capacity_bytes)
    except Exception:
        cap = 64 * 1024 * 1024          # conservative: v7x physical per-TC VMEM
    vmem_limit = min(cap * 3 // 4, 100 * 1024 * 1024)   # <=48 MiB on v7x, ~96 MiB on v5e/v6e
    tile_budget = vmem_limit * 3 // 4                   # headroom for compiler scratch
    return vmem_limit, tile_budget


def _pick_tile(p, n, c, c_old, x_bytes, old_bytes, tile_budget):
    """Lane tile (multiple of 128, <=32K lanes) sized from a VMEM budget."""
    io_per_lane = 2 * (c * x_bytes + c_old * old_bytes + 4)     # double-buffered DMA
    scratch_per_lane = 4 * (4 * c + 2 * c_old + 8)              # f32 temporaries (upper bound)
    per_lane = io_per_lane + scratch_per_lane
    tp = (tile_budget // per_lane) // 128 * 128
    tp = max(128, min(tp, 32 * 1024))
    tp = min(tp, max(128, (p // 128) * 128))                    # never exceed P (no wrapper pad)
    # v7x megacore: keep enough grid steps to split across both TensorCores.
    while n * pl.cdiv(p, tp) < 8 and tp >= 1024:
        tp = (tp // 2) // 128 * 128
    return tp


def icarl_criterion(inputs, targets, output_old, *, reduction='mean',
                    ignore_index=255, bkg=False, compute_dtype=None):
    """Pallas port of IcarlCriterion.forward (reduction in {'mean','sum'}).

    inputs / output_old may be float32 or bfloat16 (bf16 halves the two
    dominant HBM streams and is upcast per tile inside the kernel).  Passing
    compute_dtype=jnp.bfloat16 additionally does the elementwise /
    transcendental math in bf16 with f32 accumulation (recommended on
    v6e/v7x; keep the f32 default on v5e, which has no bf16 VPU/EUP).
    """
    # TODO(synk): reduction='none' (per-pixel (N,H,W) map output) not implemented.
    assert reduction in ('mean', 'sum')
    if compute_dtype is None:
        compute_dtype = jnp.float32

    n, c, h, w = inputs.shape
    c_old = output_old.shape[1]
    p = h * w
    m = n * p

    # NCHW kept native: free reshapes; no transpose / dtype-cast / channel-pad copies.
    x = inputs.reshape(n, c, p)
    old = output_old.reshape(n, c_old, p)
    lbl = targets.reshape(n, 1, p)
    if lbl.dtype != jnp.int32:
        lbl = lbl.astype(jnp.int32)

    vmem_limit, tile_budget = _vmem_budgets()

    if p < 128:
        # Tiny spatial maps only: pad the (small) pixel axis up to one lane width.
        pad = 128 - p
        x = jnp.pad(x, ((0, 0), (0, 0), (0, pad)))
        old = jnp.pad(old, ((0, 0), (0, 0), (0, pad)))
        lbl = jnp.pad(lbl, ((0, 0), (0, 0), (0, pad)),
                      constant_values=ignore_index)
        tp = 128
        pp = 128
    else:
        tp = _pick_tile(p, n, c, c_old, x.dtype.itemsize, old.dtype.itemsize,
                        tile_budget)
        pp = p
    g_p = pl.cdiv(pp, tp)
    needs_mask = (p % tp) != 0

    kernel = functools.partial(
        _icarl_kernel, ignore_index=ignore_index, c_old=c_old, bkg=bkg,
        p_real=p, tp=tp, needs_mask=needs_mask, compute_dtype=compute_dtype)

    partials = pl.pallas_call(
        kernel,
        out_shape=jax.ShapeDtypeStruct((1, n * g_p * 128), jnp.float32),
        grid=(n, g_p),
        in_specs=[
            pl.BlockSpec((1, c, tp), lambda i, j: (i, 0, j)),       # logits tile
            pl.BlockSpec((1, c_old, tp), lambda i, j: (i, 0, j)),   # old outputs (native width)
            pl.BlockSpec((1, 1, tp), lambda i, j: (i, 0, j)),       # labels tile
        ],
        out_specs=pl.BlockSpec((1, 128), lambda i, j: (0, i * g_p + j)),
        compiler_params=pltpu.CompilerParams(
            dimension_semantics=("parallel", "parallel"),
            vmem_limit_bytes=int(vmem_limit)),
    )(x, old, lbl)

    total = jnp.sum(partials)
    if reduction == 'mean':
        return total / jnp.float32(m)
    return total


def icarl_criterion_ref(inputs, targets, output_old, *, reduction='mean',
                        ignore_index=255, bkg=False):
    """Pure-JAX reference mirroring the PyTorch module."""
    n, c, h, w = inputs.shape
    c_old = output_old.shape[1]
    labels_new = jnp.where(targets != ignore_index, targets, c)
    t = jax.nn.one_hot(labels_new, c + 1, dtype=jnp.float32)         # (N,H,W,C+1)
    t = jnp.transpose(t, (0, 3, 1, 2))[:, :c]                        # (N,C,H,W)
    if bkg:
        t = t.at[:, 1:c_old].set(output_old[:, 1:].astype(jnp.float32))
    else:
        t = t.at[:, :c_old].set(output_old.astype(jnp.float32))
    x = inputs.astype(jnp.float32)
    loss = jnp.maximum(x, 0.0) - x * t + jnp.log1p(jnp.exp(-jnp.abs(x)))
    loss = loss.sum(axis=1)
    if reduction == 'mean':
        return loss.mean()
    return loss.sum()


if __name__ == "__main__":
    key = jax.random.PRNGKey(0)
    k1, k2, k3, k4 = jax.random.split(key, 4)

    N, C, H, W = 2, 6, 16, 16
    C_OLD = 4

    inputs = jax.random.normal(k1, (N, C, H, W), dtype=jnp.float32)
    output_old = jax.nn.sigmoid(
        jax.random.normal(k2, (N, C_OLD, H, W), dtype=jnp.float32))
    labels = jax.random.randint(k3, (N, H, W), 0, C, dtype=jnp.int32)
    ignore_mask = jax.random.uniform(k4, (N, H, W)) < 0.1
    targets = jnp.where(ignore_mask, 255, labels).astype(jnp.int32)

    # f32 streams, f32 compute: tight tolerance, both reductions / bkg modes.
    for red, bkg in (('mean', False), ('sum', True)):
        got = jax.block_until_ready(
            icarl_criterion(inputs, targets, output_old,
                            reduction=red, ignore_index=255, bkg=bkg))
        want = icarl_criterion_ref(inputs, targets, output_old,
                                   reduction=red, ignore_index=255, bkg=bkg)
        assert jnp.allclose(got, want, rtol=1e-4, atol=1e-4), (red, bkg, got, want)

    # bf16 HBM streams + bf16 elementwise/EUP math (v6e/v7x perf mode), f32 accumulation.
    x_bf16 = inputs.astype(jnp.bfloat16)
    old_bf16 = output_old.astype(jnp.bfloat16)
    got_bf16 = jax.block_until_ready(
        icarl_criterion(x_bf16, targets, old_bf16,
                        reduction='mean', ignore_index=255, bkg=False,
                        compute_dtype=jnp.bfloat16))
    want_bf16 = icarl_criterion_ref(x_bf16.astype(jnp.float32), targets,
                                    old_bf16.astype(jnp.float32),
                                    reduction='mean', ignore_index=255, bkg=False)
    assert jnp.allclose(got_bf16, want_bf16, rtol=3e-2, atol=3e-2), (got_bf16, want_bf16)

    # Larger channel count with tiny spatial maps: exercises the P<128 lane-pad
    # path (f32) and, in the bf16 run, the MXU channel-reduce path (C >= 64).
    N2, C2, H2, W2, C_OLD2 = 1, 72, 8, 8, 40
    j1, j2, j3 = jax.random.split(jax.random.PRNGKey(1), 3)
    inputs2 = jax.random.normal(j1, (N2, C2, H2, W2), dtype=jnp.float32)
    output_old2 = jax.nn.sigmoid(
        jax.random.normal(j2, (N2, C_OLD2, H2, W2), dtype=jnp.float32))
    targets2 = jax.random.randint(j3, (N2, H2, W2), 0, C2, dtype=jnp.int32)

    got2 = jax.block_until_ready(
        icarl_criterion(inputs2, targets2, output_old2,
                        reduction='mean', ignore_index=255, bkg=True))
    want2 = icarl_criterion_ref(inputs2, targets2, output_old2,
                                reduction='mean', ignore_index=255, bkg=True)
    assert jnp.allclose(got2, want2, rtol=1e-4, atol=1e-4), (got2, want2)

    got2_bf16 = jax.block_until_ready(
        icarl_criterion(inputs2.astype(jnp.bfloat16), targets2,
                        output_old2.astype(jnp.bfloat16),
                        reduction='mean', ignore_index=255, bkg=True,
                        compute_dtype=jnp.bfloat16))
    want2_bf16 = icarl_criterion_ref(
        inputs2.astype(jnp.bfloat16).astype(jnp.float32), targets2,
        output_old2.astype(jnp.bfloat16).astype(jnp.float32),
        reduction='mean', ignore_index=255, bkg=True)
    assert jnp.allclose(got2_bf16, want2_bf16, rtol=3e-2, atol=3e-2), (got2_bf16, want2_bf16)

    print("KERNEL_OK")
</pallas_src>

<mosaic_0001>
module attributes {stable_mosaic.version = 11 : i64} {
  func.func @_icarl_kernel(%arg0: i32, %arg1: i32, %arg2: memref<1x6x256xf32, #tpu.memory_space<vmem>>, %arg3: memref<1x4x256xf32, #tpu.memory_space<vmem>>, %arg4: memref<1x1x256xi32, #tpu.memory_space<vmem>>, %arg5: memref<1x128xf32, #tpu.memory_space<vmem>>) attributes {dimension_semantics = [#tpu.dimension_semantics<parallel>, #tpu.dimension_semantics<parallel>], iteration_bounds = array<i64: 2, 1>, scalar_prefetch = 0 : i64, scratch_operands = 0 : i64, tpu.core_type = #tpu.core_type<tc>, window_params = [{transform_indices = @transform_0, window_bounds = array<i64: 1, 6, 256>}, {transform_indices = @transform_1, window_bounds = array<i64: 1, 4, 256>}, {transform_indices = @transform_2, window_bounds = array<i64: 1, 1, 256>}, {transform_indices = @transform_3, window_bounds = array<i64: 1, 128>}]} {
    %c0 = arith.constant 0 : index
    %c0_0 = arith.constant 0 : index
    %c0_1 = arith.constant 0 : index
    %0 = vector.load %arg2[%c0, %c0_0, %c0_1] : memref<1x6x256xf32, #tpu.memory_space<vmem>>, vector<1x6x256xf32>
    %1 = vector.shape_cast %0 : vector<1x6x256xf32> to vector<6x256xf32>
    %c0_2 = arith.constant 0 : index
    %c0_3 = arith.constant 0 : index
    %c0_4 = arith.constant 0 : index
    %2 = vector.load %arg3[%c0_2, %c0_3, %c0_4] : memref<1x4x256xf32, #tpu.memory_space<vmem>>, vector<1x4x256xf32>
    %3 = vector.shape_cast %2 : vector<1x4x256xf32> to vector<4x256xf32>
    %c0_5 = arith.constant 0 : index
    %c0_6 = arith.constant 0 : index
    %c0_7 = arith.constant 0 : index
    %4 = vector.load %arg4[%c0_5, %c0_6, %c0_7] : memref<1x1x256xi32, #tpu.memory_space<vmem>>, vector<1x1x256xi32>
    %5 = vector.shape_cast %4 : vector<1x1x256xi32> to vector<1x256xi32>
    %c255_i32 = arith.constant 255 : i32
    %6 = vector.broadcast %c255_i32 : i32 to vector<1x256xi32>
    %7 = arith.cmpi ne, %5, %6 : vector<1x256xi32>
    %c4_i32 = arith.constant 4 : i32
    %8 = vector.broadcast %c4_i32 : i32 to vector<1x256xi32>
    %9 = arith.cmpi sge, %5, %8 : vector<1x256xi32>
    %10 = arith.andi %7, %9 : vector<1x256xi1>
    %c-1_i32 = arith.constant -1 : i32
    %11 = vector.broadcast %c-1_i32 : i32 to vector<1x256xi32>
    %12 = arith.select %10, %5, %11 : vector<1x256xi1>, vector<1x256xi32>
    %13 = tpu.iota {dimensions = array<i32: 0>} : vector<6x256xi32>
    %14 = vector.broadcast %12 : vector<1x256xi32> to vector<6x256xi32>
    %15 = arith.cmpi eq, %13, %14 : vector<6x256xi32>
    %cst = arith.constant 0.000000e+00 : f32
    %16 = vector.broadcast %cst : f32 to vector<6x256xf32>
    %17 = arith.select %15, %1, %16 : vector<6x256xi1>, vector<6x256xf32>
    %cst_8 = arith.constant 0.000000e+00 : f32
    %18 = vector.broadcast %cst_8 : f32 to vector<6x256xf32>
    %19 = arith.maximumf %1, %18 : vector<6x256xf32>
    %20 = arith.subf %19, %17 : vector<6x256xf32>
    %21 = math.absf %1 : vector<6x256xf32>
    %cst_9 = arith.constant 0.000000e+00 : f32
    %22 = vector.broadcast %cst_9 : f32 to vector<6x256xf32>
    %23 = arith.subf %22, %21 : vector<6x256xf32>
    %24 = math.exp %23 : vector<6x256xf32>
    %25 = math.log1p %24 : vector<6x256xf32>
    %26 = arith.addf %20, %25 : vector<6x256xf32>
    %27 = vector.extract_strided_slice %1 {offsets = [0, 0], sizes = [4, 256], strides = [1, 1]} : vector<6x256xf32> to vector<4x256xf32>
    %28 = arith.mulf %27, %3 : vector<4x256xf32>
    %29 = vector.extract_strided_slice %26 {offsets = [0, 0], sizes = [4, 256], strides = [1, 1]} : vector<6x256xf32> to vector<4x256xf32>
    %30 = arith.subf %29, %28 : vector<4x256xf32>
    %cst_10 = arith.constant dense<0.000000e+00> : vector<256xf32>
    %31 = vector.multi_reduction <add>, %30, %cst_10 [0] : vector<4x256xf32> to vector<256xf32>
    %32 = vector.shape_cast %31 : vector<256xf32> to vector<1x256xf32>
    %33 = vector.extract_strided_slice %26 {offsets = [4, 0], sizes = [2, 256], strides = [1, 1]} : vector<6x256xf32> to vector<2x256xf32>
    %cst_11 = arith.constant dense<0.000000e+00> : vector<256xf32>
    %34 = vector.multi_reduction <add>, %33, %cst_11 [0] : vector<2x256xf32> to vector<256xf32>
    %35 = vector.shape_cast %34 : vector<256xf32> to vector<1x256xf32>
    %36 = arith.addf %32, %35 : vector<1x256xf32>
    %37 = vector.extract_strided_slice %36 {offsets = [0, 0], sizes = [1, 128], strides = [1, 1]} : vector<1x256xf32> to vector<1x128xf32>
    %38 = vector.extract_strided_slice %36 {offsets = [0, 128], sizes = [1, 128], strides = [1, 1]} : vector<1x256xf32> to vector<1x128xf32>
    %39 = arith.addf %37, %38 : vector<1x128xf32>
    %c0_12 = arith.constant 0 : index
    %c0_13 = arith.constant 0 : index
    %40 = vector.load %arg5[%c0_12, %c0_13] : memref<1x128xf32, #tpu.memory_space<vmem>>, vector<1x128xf32>
    tpu.vector_store %arg5[%c0_12, %c0_13], %39 {strides = array<i32>} : memref<1x128xf32, #tpu.memory_space<vmem>>, vector<1x128xf32>,
    return
  }
  func.func @transform_0(%arg0: i32, %arg1: i32) -> (i32, i32, i32) {
    %c0_i32 = arith.constant 0 : i32
    %c0_i32_0 = arith.constant 0 : i32
    return %arg0, %c0_i32, %arg1 : i32, i32, i32
  }
  func.func @transform_1(%arg0: i32, %arg1: i32) -> (i32, i32, i32) {
    %c0_i32 = arith.constant 0 : i32
    %c0_i32_0 = arith.constant 0 : i32
    return %arg0, %c0_i32, %arg1 : i32, i32, i32
  }
  func.func @transform_2(%arg0: i32, %arg1: i32) -> (i32, i32, i32) {
    %c0_i32 = arith.constant 0 : i32
    %c0_i32_0 = arith.constant 0 : i32
    return %arg0, %c0_i32, %arg1 : i32, i32, i32
  }
  func.func @transform_3(%arg0: i32, %arg1: i32) -> (i32, i32) {
    %c1_i32 = arith.constant 1 : i32
    %0 = arith.muli %arg0, %c1_i32 : i32
    %1 = arith.addi %0, %arg1 : i32
    %c0_i32 = arith.constant 0 : i32
    %c0_i32_0 = arith.constant 0 : i32
    return %c0_i32, %1 : i32, i32
  }
}

</mosaic_0001>

<bundles_post_ra>
// kernel: tpu_custom_call.1
= control target key start
LH: loop header
LB: loop body
LE: loop exit
PB: predicated region body
PF: predicated region fallthrough
CT: control target
= control target key end

     0   :  { %8 = vsyncpa [#allocation3], 0  ;;  %s774_s0 = inlined_call_operand.vmem [shape: f32[2,6,256], index: 0, kind: input, shape index: {}]   ;;  %s775_s1 = inlined_call_operand.vmem [shape: f32[2,4,256], index: 1, kind: input, shape index: {}]   ;;  %s776_s2 = inlined_call_operand.vmem [shape: s32[2,1,256], index: 2, kind: input, shape index: {}]   ;;  %s777_s3 = inlined_call_operand.hbm [shape: f32[1,256], index: 3, kind: output, shape index: {}]  }
   0x1   :  { %10 = vsyncpa [#allocation3 + $0x1], 0  ;;  %s664_s12 = smov 0   ;;  %s666_s13 = smov 0  }
   0x2   :  { %s668_s14 = smov 0   ;;  %s670_s15 = smov 0  }
   0x3   :  { %s672_s16 = smov 0   ;;  %s674_s17 = smov 0  }
   0x4 LB: > { %s486_s18 = sadd.s32 4294967295, %s641_s17   ;;  %s487_s19 = sadd.s32 4294967294, %s641_s17   ;;  %s641_s17 = sphi %s674_s17, %s16_s17   ;;  %s637_s16 = sphi %s672_s16, %s784_s16   ;;  %s633_s15 = sphi %s670_s15, %s783_s15   ;;  %s629_s14 = sphi %s668_s14, %s782_s14   ;;  %s625_s13 = sphi %s666_s13, %s781_s13   ;;  %s621_s12 = sphi %s664_s12, %s780_s12  }
   0x5   : > { %s28_s20 = sadd.s32 1, %s637_s16  ;;  %s121_s21 = sadd.s32 1, %s629_s14 }
   0x6   : > { %p30_p0 = scmp.ge.s32.totalorder %s28_s20, 2  ;;  %p131_p1 = scmp.ne.s32.totalorder %s629_s14, %s625_s13 }
   0x7   : > { %p132_p2 = scmp.eq.s32.totalorder %s486_s18, 1  ;;  %p137_p3 = scmp.ne.s32.totalorder %s625_s13, %s621_s12 }
   0x8   : > { %s786_s20 = smov (%p30_p0, %s28_s20), 0  ;;  %p138_p5 = scmp.eq.s32.totalorder %s487_s19, 1 }
   0x9   : > { %p704_p4 = por %p132_p2, %p131_p1  ;;  %s118_s23 = ssub.s32 %s637_s16, %s786_s20 }
   0xa   : > { %p490_p6 = scmp.ge.s32.totalorder %s641_s17, 1  ;;  %p119_p7 = scmp.eq.s32.totalorder %s118_s23, 0 }
   0xb   : > { %p711_p8 = por %p138_p5, %p137_p3  ;;  %p194_p9 = scmp.lt.s32.totalorder %s641_s17, 3 }
   0xc   : > { %s717_s25 = scalar_select %p119_p7, %s629_s14, %s121_s21  }
   0xd   : > { %p195_p10 = pnand %p490_p6, %p194_p9 }
   0xe   : > { %p239_p11 = scmp.lt.s32.totalorder (!%p195_p10), %s633_s15, 1  ;;  %s236_s18 = sand.u32 (!%p195_p10), 1, %s625_s13  }
   0xf   : > { %198 = sbr.rel (%p195_p10) target bundleno = 99 (0x63), region = 32  ;;  %s237_s19 = scalar_lea.vmem (!%p195_p10), [#allocation2], %s236_s18 }
  0x10   : > { %s383_s21 = sshll.u32 (!%p195_p10), %s237_s19, 4  ;;  %s496_s23 = sshll.u32 (!%p195_p10), %s633_s15, 4  ;;  %s384_s21 = int_to_ptr.vmem [resolvable:$true] %s383_s21 }
  0x11   : > { %s381_s28 = scalar_lea.hbm (!%p195_p10), %s777_s3, %s496_s23  ;;  %s370_s29 = scalar_lea.sflag (!%p195_p10), [#allocation3], %s236_s18 }
  0x14   : > { %s721_s26 = scalar_select %p239_p11, %s633_s15, 1  ;;  %v276_v9 = vlaneseq  ;;  %vm329_vm7 = vcmask 1043456   ;;  %vm350_vm8 = vcmask 1041408  }
  0x16   : > { %s499_s27 = sshll.u32 %s721_s26, 4  ;;  %s495_s4 = sshll.u32 %s721_s26, 1  ;;  %v277_v10 = vshrl.u32 %v276_v9, 7 }
  0x17   : > { %s246_s30 = scalar_lea.vmem %s774_s0, %s499_s27  ;;  %s265_s7 = scalar_lea.vmem %s776_s2, %s495_s4 }
  0x18   : > { %v268_v0 = vld [vmem:[%s246_s30] sm:$0x3f]  ;;  %v269_v1 = vld [vmem:[%s246_s30 + $0x8] sm:$0x3f]  ;;  %v280_v14 = vsub.s32 0, %v277_v10  ;;  %v284_v17 = vsub.s32 1, %v277_v10 }
  0x19   : > { %v294_v2 = vand.u32 2147483647, %v268_v0  ;;  %v295_v3 = vand.u32 2147483647, %v269_v1  ;;  %v271_v8 = vld [vmem:[%s265_s7] sm:$0x3] }
  0x1a   : > { %vm272_vm0 = vcmp.ne.s32.totalorder %v271_v8, 255  ;;  %vm273_vm1 = vcmp.ge.s32.totalorder %v271_v8, 4  ;;  %s500_s8 = sshll.u32 %s721_s26, 3  ;;  %v290_v24 = vmax.f32 %v268_v0, 0.0  ;;  %v291_v28 = vmax.f32 %v269_v1, 0.0  ;;  %s565_s30 = scalar_lea.vmem %s384_s21, 16 }
  0x1b   : > { %v296_v4 = vsub.f32 0.0, %v294_v2  ;;  %v297_v5 = vsub.f32 0.0, %v295_v3  ;;  %vm274_vm2 = vmand %vm272_vm0, %vm273_vm1  ;;  %s256_s11 = scalar_lea.vmem %s775_s1, %s500_s8  ;;  %p566_p12 = scmp.ne.s32.totalorder %s384_s21, %s565_s30 }
  0x1c   : > { %v275_v16 = vsel %vm274_vm2, %v271_v8, 4294967295  ;;  %v270_v23 = vld [vmem:[%s256_s11] sm:$0xff]  ;;  %s643_s4 = smov [#allocation2]  }
  0x1d   : > { %v298_v6 = vmul.f32 1.442695, %v296_v4  ;;  %v300_v7 = vmul.f32 1.442695, %v297_v5  ;;  %v281_v18 = vrot.slane %v275_v16, %v280_v14  ;;  %v285_v19 = vrot.slane %v275_v16, %v284_v17  ;;  %p567_p13 = pnand %p566_p12, %p704_p4  ;;  %s569_s5 = sshll.u32 %s643_s4, 4  ;;  %s570_s5 = int_to_ptr.vmem [resolvable:$false] %s569_s5 }
  0x1e   : > { %v323_v32 = vcombine.high %v270_v23, %v270_v23  ;;  %v325_v40 = vmul.f32 %v270_v23, %v268_v0  ;;  %s571_s6 = scalar_lea.vmem %s570_s5, 32  ;;  %p572_p1 = scmp.lt.s32.totalorder %s384_s21, %s570_s5 }
  0x1f   : > { %557 = vpow2.f32 %v298_v6  ;;  %vm286_vm3 = vcmp.eq.s32.totalorder %v277_v10, %v281_v18  ;;  %vm287_vm4 = vcmp.eq.s32.totalorder %v277_v10, %v285_v19  ;;  %p568_p0 = pneg %p567_p13  ;;  %p573_p2 = scmp.lt.s32.totalorder %s571_s6, %s565_s30 }
  0x20   : > { %559 = vpow2.f32 %v300_v7  ;;  %v288_v27 = vsel %vm286_vm3, %v268_v0, 0.0  ;;  %v289_v30 = vsel %vm287_vm4, %v269_v1, 0.0  ;;  %v326_v42 = vmul.f32 %v323_v32, %v269_v1 }
  0x21   : > { %v292_v34 = vsub.f32 %v290_v24, %v288_v27  ;;  %v293_v37 = vsub.f32 %v291_v28, %v289_v30  ;;  %p574_p3 = por %p573_p2, %p572_p1 }
  0x23   : > { %p575_p5 = pnand %p574_p3, %p568_p0 }
  0x2c   : > { %v558_v11 = vpop.eup %557 }
  0x2d   : > { %v560_v12 = vpop.eup %559  ;;  %v302_v13 = vadd.f32 1.0, %v558_v11  ;;  %v305_v20 = vmul.f32 -0.5, %v558_v11  ;;  %v308_v25 = vand.u32 2147483647, %v558_v11 }
  0x2e   : > { %v311_v15 = vadd.f32 1.0, %v560_v12  ;;  %v314_v21 = vmul.f32 -0.5, %v560_v12  ;;  %v317_v29 = vand.u32 2147483647, %v560_v12 }
  0x2f   : > { %561 = vlog2.f32 %v302_v13  ;;  %v306_v22 = vadd.f32 1.0, %v305_v20  ;;  %vm309_vm5 = vcmp.lt.f32.partialorder %v308_v25, 0.0004427343 }
  0x30   : > { %563 = vlog2.f32 %v311_v15  ;;  %v315_v26 = vadd.f32 1.0, %v314_v21  ;;  %vm318_vm6 = vcmp.lt.f32.partialorder %v317_v29, 0.0004427343 }
  0x31   : > { %v307_v31 = vmul.f32 %v558_v11, %v306_v22 }
  0x32   : > { %v316_v35 = vmul.f32 %v560_v12, %v315_v26 }
  0x3c   : > { %v562_v33 = vpop.eup %561 }
  0x3d   : > { %v564_v36 = vpop.eup %563  ;;  %v304_v38 = vmul.f32 0.6931472, %v562_v33 }
  0x3e   : > { %v313_v39 = vmul.f32 0.6931472, %v564_v36 }
  0x3f   : > { %v310_v41 = vsel %vm309_vm5, %v307_v31, %v304_v38 }
  0x40   : > { %v319_v43 = vsel %vm318_vm6, %v316_v35, %v313_v39  ;;  %v320_v44 = vadd.f32 %v310_v41, %v292_v34 }
  0x41   : > { %v321_v45 = vadd.f32 %v319_v43, %v293_v37 }
  0x42   : > { %v327_v46 = vsub.f32 %v320_v44, %v325_v40  ;;  %v346_v47 = vrot.slane %v320_v44, 4 }
  0x43   : > { %v328_v48 = vsub.f32 %v321_v45, %v326_v42  ;;  %v347_v49 = vrot.slane %v321_v45, 4 }
  0x44   : > { %v330_v50 = vsel %vm329_vm7, %v327_v46, 0.0  ;;  %v351_v51 = vsel %vm350_vm8, %v346_v47, 0.0 }
  0x45   : > { %v331_v52 = vrot.slane %v330_v50, 4  ;;  %v337_v53 = vsel %vm329_vm7, %v328_v48, 0.0  ;;  %v352_v54 = vrot.slane %v351_v51, 4  ;;  %v358_v55 = vsel %vm350_vm8, %v347_v49, 0.0 }
  0x46   : > { %v338_v56 = vrot.slane %v337_v53, 4  ;;  %v359_v57 = vrot.slane %v358_v55, 4 }
  0x47   : > { %v332_v58 = vadd.f32 %v331_v52, %v330_v50  ;;  %v353_v59 = vadd.f32 %v352_v54, %v351_v51 }
  0x48   : > { %v339_v60 = vadd.f32 %v338_v56, %v337_v53  ;;  %v360_v61 = vadd.f32 %v359_v57, %v358_v55 }
  0x49   : > { %v333_v62 = vrot.slane %v332_v58, 2  ;;  %v354_v63 = vrot.slane %v353_v59, 2 }
  0x4a   : > { %v340_v0 = vrot.slane %v339_v60, 2  ;;  %v361_v1 = vrot.slane %v360_v61, 2 }
  0x4b   : > { %v334_v2 = vadd.f32 %v333_v62, %v332_v58  ;;  %v355_v3 = vadd.f32 %v354_v63, %v353_v59 }
  0x4c   : > { %v341_v4 = vadd.f32 %v340_v0, %v339_v60  ;;  %v362_v5 = vadd.f32 %v361_v1, %v360_v61 }
  0x4d   : > { %v335_v6 = vrot.slane %v334_v2, 1  ;;  %v356_v7 = vrot.slane %v355_v3, 1 }
  0x4e   : > { %v342_v8 = vrot.slane %v341_v4, 1  ;;  %v363_v9 = vrot.slane %v362_v5, 1 }
  0x4f   : > { %v336_v10 = vadd.f32 %v335_v6, %v334_v2  ;;  %v357_v11 = vadd.f32 %v356_v7, %v355_v3 }
  0x50   : > { %v343_v12 = vadd.f32 %v342_v8, %v341_v4  ;;  %v364_v13 = vadd.f32 %v363_v9, %v362_v5 }
  0x51   : > { %v365_v14 = vadd.f32 %v357_v11, %v336_v10 }
  0x52   : > { %v366_v15 = vadd.f32 %v364_v13, %v343_v12 }
  0x54   : > { %v367_v16 = vadd.f32 %v366_v15, %v365_v14 }
  0x56   : > { %368 = vst [vmem:[%s237_s19] sm:$0x1] %v367_v16 }
  0x57   : > { %578 = shalt.err (!%p575_p5)
}
  0x58   : > { %s579_s15 = scalar_lea.hbm %s381_s28, 16  ;;  %s583_s9 = scalar_lea.hbm %s777_s3, 32 }
  0x59   : > { %p580_p6 = scmp.ne.s32.totalorder %s381_s28, %s579_s15  ;;  %p584_p10 = scmp.lt.s32.totalorder %s381_s28, %s777_s3 }
  0x5a   : > { %p585_p11 = scmp.lt.s32.totalorder %s583_s9, %s579_s15 }
  0x5b   : > { %p581_p7 = pnand %p580_p6, %p704_p4 }
  0x5c   : > { %p586_p12 = por %p585_p11, %p584_p10 }
  0x5d   : > { %p582_p9 = pneg %p581_p7 }
  0x5f   : > { %p587_p13 = pnand %p586_p12, %p582_p9 }
  0x61   : > { %590 = shalt.err (!%p587_p13)
}
  0x62   : > { %501 = dma.vmem_to_hbm [thread:$0]  (%p704_p4), %s384_s21, 16, %s381_s28, %s370_s29  }
  0x63 PF: > { %p507_p0 = scmp.ge.s32.totalorder %s641_s17, 2  ;;  %s395_s18 = sand.u32 1, %s621_s12  }
  0x64   : > { %s396_s19 = scalar_lea.sflag [#allocation3], %s395_s18 }
  0x65   : > { %p504_p1 = pnand %p507_p0, %p711_p8 }
  0x67   : > { %p505_p2 = pneg %p504_p1 }
  0x69   : > { %616 = dma.done.wait (%p505_p2), %s396_s19, 16  }
  0x6a   : > { %618 = vsyncadd (%p505_p2), %s396_s19, 4294967280  ;;  %s16_s17 = sadd.s32 1, %s641_s17   ;;  %s780_s12 = smov %s625_s13 }
  0x6b   : > { %p13_p3 = scmp.ge.s32.totalorder %s16_s17, 4   ;;  %s781_s13 = smov %s629_s14 }
  0x6c   : > { %s782_s14 = smov %s717_s25  ;;  %s783_s15 = smov %s637_s16 }
  0x6d   : > { %s784_s16 = smov %s786_s20  ;;  %15 = sbr.rel (!%p13_p3) target bundleno = 4 (0x4), region = 73 }
  0x72   :  { %400 = vsyncpa [#allocation3], 1 }
  0x73   :  { %402 = vsyncpa [#allocation3 + $0x1], 1 }

</bundles_post_ra>
